<compile_context>
chip_gen: v5e
topology: v5e:2x2
jax: 0.10.0
libtpu: 0.0.40
codegen_flags: <defaults>
</compile_context>

<pallas_src>
import functools

import jax
import jax.numpy as jnp
import numpy as np
from jax.experimental import pallas as pl
from jax.experimental.pallas import tpu as pltpu

_CHUNK_ROWS = 8  # one f32 vreg of rows per inner-loop step


def _round_up(v, m):
    return -(-v // m) * m


# --------------------------------- kernel ----------------------------------- #
def _ghm_stats_kernel(x_ref, t_ref, cnt_ref, loss_ref, *,
                      bins, bins_pad, valid_rows, mask_padding):
    """Accumulates per-bin counts and per-bin un-weighted stable-BCE sums.

    Grid = (shard, class_tile, row_tile).  The output block index is constant
    along the row_tile axis, so cnt_ref / loss_ref stay VMEM resident and are
    used directly as accumulators (no scratch, no finalize copy).
    """
    it = pl.program_id(2)

    @pl.when(it == 0)
    def _init():
        cnt_ref[...] = jnp.zeros(cnt_ref.shape, cnt_ref.dtype)
        loss_ref[...] = jnp.zeros(loss_ref.shape, loss_ref.dtype)

    tile_rows, tile_c = x_ref.shape
    n_chunks = tile_rows // _CHUNK_ROWS
    # Global row offset of this tile (only needed to mask padded rows).
    tile_row0 = (pl.program_id(0) * pl.num_programs(2) + it) * tile_rows

    def chunk_body(ci, carry):
        cnt_list, loss_list = carry
        r0 = pl.multiple_of(ci * _CHUNK_ROWS, _CHUNK_ROWS)
        # Upcast immediately (supports bf16 inputs; all math stays f32).
        x = x_ref[pl.ds(r0, _CHUNK_ROWS), :].astype(jnp.float32)
        t = t_ref[pl.ds(r0, _CHUNK_ROWS), :].astype(jnp.float32)

        # Share exp(-|x|) between the sigmoid and the stable log1p term.
        e = jnp.exp(-jnp.abs(x))
        sig_pos = 1.0 / (1.0 + e)                      # sigmoid(|x|)
        sig = jnp.where(x >= 0.0, sig_pos, 1.0 - sig_pos)

        # g = |custom_loss_grad(x, t)| = |sigmoid(x) - t|   (detached value)
        g = jnp.abs(sig - t)
        bin_idx = jnp.floor(g * (bins - 0.0001)).astype(jnp.int32)
        # Un-weighted, numerically stable BCE-with-logits; the per-bin weight
        # beta is applied later as a dot in JAX.
        per_elem = jnp.maximum(x, 0.0) - x * t + jnp.log1p(e)

        if mask_padding:
            row = (tile_row0 + r0 +
                   jax.lax.broadcasted_iota(jnp.int32, (_CHUNK_ROWS, tile_c), 0))
            # Padded rows get an index that never matches a real bin.
            bin_idx = jnp.where(row < valid_rows, bin_idx, -1)

        new_cnt, new_loss = [], []
        for i in range(bins):              # bins is a small static constant
            eq_f = jnp.where(bin_idx == i, 1.0, 0.0)   # one select, reused
            new_cnt.append(cnt_list[i] + eq_f)
            new_loss.append(loss_list[i] + eq_f * per_elem)
        return tuple(new_cnt), tuple(new_loss)

    zero = jnp.zeros((_CHUNK_ROWS, tile_c), jnp.float32)
    init = (tuple(zero for _ in range(bins)), tuple(zero for _ in range(bins)))
    cnt_list, loss_list = jax.lax.fori_loop(0, n_chunks, chunk_body, init)

    # One sublane reduction per bin per tile (off the VALU critical path),
    # packed into a lane-dense (bins_pad, tile_c) update; bins_pad is a
    # sublane multiple so the pack/stores are unmasked.
    cnt_rows = [jnp.sum(a, axis=0, keepdims=True) for a in cnt_list]
    loss_rows = [jnp.sum(a, axis=0, keepdims=True) for a in loss_list]
    if bins_pad > bins:
        pad = jnp.zeros((bins_pad - bins, tile_c), jnp.float32)
        cnt_rows.append(pad)
        loss_rows.append(pad)
    cnt_ref[0] += jnp.concatenate(cnt_rows, axis=0)
    loss_ref[0] += jnp.concatenate(loss_rows, axis=0)


# -------------------------------- wrappers ----------------------------------- #
def _num_tensorcores():
    """2 shards on v7x (two TensorCores per chip), else 1 (v5e/v6e)."""
    try:
        kind = jax.devices()[0].device_kind.lower()
    except Exception:
        return 1
    return 2 if "v7" in kind else 1


def _choose_tiling(n_rows, n_cols, itemsize, num_shards, target_block_bytes,
                   max_tile_cols):
    # Lane (class) tiling: only for wide C that is a multiple of 128.  Keeping
    # tile_c at ~128 lanes also keeps the per-bin vreg accumulators small.
    tile_c = n_cols
    if n_cols > max_tile_cols and n_cols % 128 == 0:
        cap = max(128, (max_tile_cols // 128) * 128)
        tile_c = 128
        for cand in range(cap, 127, -128):
            if n_cols % cand == 0:
                tile_c = cand
                break
    c_tiles = n_cols // tile_c

    # Row tiling: size blocks by bytes to amortize the ~0.35us per-grid-step
    # overhead; hard-cap so 2 inputs x 2 pipeline buffers stay well inside the
    # scoped-VMEM default on every chip generation.
    bytes_per_row = max(1, tile_c * itemsize)
    max_rows = max(_CHUNK_ROWS,
                   (target_block_bytes // bytes_per_row) // _CHUNK_ROWS * _CHUNK_ROWS)
    hard_cap = max(_CHUNK_ROWS,
                   ((4 << 20) // bytes_per_row) // _CHUNK_ROWS * _CHUNK_ROWS)
    max_rows = min(max_rows, hard_cap)

    rows_per_shard = _round_up(-(-n_rows // num_shards), _CHUNK_ROWS)
    tile_n = min(max_rows, rows_per_shard)
    if itemsize == 2:                      # bf16 sublane packing
        tile_n = _round_up(tile_n, 16)
    row_tiles = -(-n_rows // tile_n)
    tiles_per_shard = -(-row_tiles // num_shards)
    rows_pad = num_shards * tiles_per_shard * tile_n
    return tile_n, tiles_per_shard, rows_pad, tile_c, c_tiles


def ghm_bin_stats(x, target, bins, *, num_shards=None,
                  target_block_bytes=2 << 20, max_tile_cols=128):
    """Returns (cnt_partial, loss_partial), each (num_shards, bins_pad, C) f32."""
    assert x.ndim == 2 and x.shape == target.shape
    n_rows, n_cols = x.shape
    if num_shards is None:
        num_shards = _num_tensorcores()

    tile_n, tiles_per_shard, rows_pad, tile_c, c_tiles = _choose_tiling(
        n_rows, n_cols, x.dtype.itemsize, num_shards, target_block_bytes,
        max_tile_cols)

    mask_padding = rows_pad != n_rows
    if mask_padding:
        pad = rows_pad - n_rows
        x = jnp.pad(x, ((0, pad), (0, 0)))
        target = jnp.pad(target, ((0, pad), (0, 0)))

    bins_pad = max(8, _round_up(bins, 8))

    kernel = functools.partial(
        _ghm_stats_kernel, bins=bins, bins_pad=bins_pad,
        valid_rows=n_rows, mask_padding=mask_padding)

    in_spec = pl.BlockSpec(
        (tile_n, tile_c), lambda s, cj, it: (s * tiles_per_shard + it, cj))
    out_spec = pl.BlockSpec(
        (1, bins_pad, tile_c), lambda s, cj, it: (s, 0, cj))

    if num_shards > 1:
        # Genuine 2-TensorCore split on v7x: each core produces its own
        # (bins_pad, C) partial, merged in the jitted finalize.
        dim_sems = (pltpu.CORE_PARALLEL, pltpu.ARBITRARY, pltpu.ARBITRARY)
    else:
        dim_sems = ("arbitrary", "arbitrary", "arbitrary")

    cnt_part, loss_part = pl.pallas_call(
        kernel,
        out_shape=(
            jax.ShapeDtypeStruct((num_shards, bins_pad, n_cols), jnp.float32),
            jax.ShapeDtypeStruct((num_shards, bins_pad, n_cols), jnp.float32),
        ),
        grid_spec=pltpu.PrefetchScalarGridSpec(
            num_scalar_prefetch=0,
            grid=(num_shards, c_tiles, tiles_per_shard),
            in_specs=[in_spec, in_spec],
            out_specs=[out_spec, out_spec],
        ),
        compiler_params=pltpu.CompilerParams(dimension_semantics=dim_sems),
    )(x, target)
    return cnt_part, loss_part


@functools.partial(jax.jit,
                   static_argnames=("bins", "alpha", "n_elems", "use_ema"))
def _ghm_finalize(cnt_part, loss_part, last_bin_count, *,
                  bins, alpha, n_elems, use_ema):
    """Fused glue: merge partials, EMA, beta, and the final weighted mean."""
    bin_count = jnp.sum(cnt_part[:, :bins, :], axis=(0, 2))      # (bins,)
    loss_sums = jnp.sum(loss_part[:, :bins, :], axis=(0, 2))     # (bins,)
    if use_ema:
        bin_count = alpha * last_bin_count + (1.0 - alpha) * bin_count
    nonempty_bins = jnp.sum((bin_count > 0).astype(jnp.float32))
    gd = jnp.maximum(bin_count * nonempty_bins, 0.0001)
    beta = n_elems / gd
    loss = jnp.dot(beta, loss_sums) / n_elems     # == mean(beta[bin_idx] * per)
    return loss, bin_count


class GHMLossPallas:
    """GHM_Loss forward (GHMC instantiation) with host-side EMA state."""

    # TODO(synk): `_last_bin_count` is host-side mutable state mirroring the
    # nn.Module; make it an explicit functional input/output if this is used
    # inside jit/scan/vmap.
    def __init__(self, bins, alpha, *, num_shards=None,
                 target_block_bytes=2 << 20, max_tile_cols=128):
        self._bins = bins
        self._alpha = alpha
        self._num_shards = num_shards
        self._target_block_bytes = target_block_bytes
        self._max_tile_cols = max_tile_cols
        self._last_bin_count = None

    def __call__(self, x, target):
        cnt_part, loss_part = ghm_bin_stats(
            x, target, self._bins, num_shards=self._num_shards,
            target_block_bytes=self._target_block_bytes,
            max_tile_cols=self._max_tile_cols)
        n_elems = float(x.shape[0] * x.shape[1])
        use_ema = self._last_bin_count is not None
        last = (self._last_bin_count if use_ema
                else jnp.zeros((self._bins,), jnp.float32))
        loss, new_count = _ghm_finalize(
            cnt_part, loss_part, last,
            bins=self._bins, alpha=self._alpha,
            n_elems=n_elems, use_ema=use_ema)
        self._last_bin_count = new_count
        return loss


# -------------------------------- reference ---------------------------------- #
def _reference_forward(x, target, bins, alpha, last_bin_count):
    x = x.astype(jnp.float32)
    target = target.astype(jnp.float32)
    # Same algebraically-exact stable sigmoid / BCE formulation as the kernel.
    e = jnp.exp(-jnp.abs(x))
    sig_pos = 1.0 / (1.0 + e)
    sig = jnp.where(x >= 0.0, sig_pos, 1.0 - sig_pos)
    g = jnp.abs(sig - target)
    bin_idx = jnp.floor(g * (bins - 0.0001)).astype(jnp.int32)
    bin_count = jnp.stack(
        [jnp.sum((bin_idx == i).astype(jnp.float32)) for i in range(bins)])
    n_elems = float(x.shape[0] * x.shape[1])
    if last_bin_count is not None:
        bin_count = alpha * last_bin_count + (1.0 - alpha) * bin_count
    nonempty_bins = jnp.sum((bin_count > 0).astype(jnp.float32))
    gd = jnp.maximum(bin_count * nonempty_bins, 0.0001)
    beta = n_elems / gd
    w = beta[bin_idx]
    per = jnp.maximum(x, 0.0) - x * target + jnp.log1p(e)
    return jnp.mean(w * per), bin_count


# ---------------------------------- main -------------------------------------- #
if __name__ == "__main__":
    BINS = 10
    ALPHA = 0.75

    key = jax.random.PRNGKey(0)
    k = jax.random.split(key, 6)

    # ---- Test 1: aligned shapes, several row tiles, EMA on the 2nd call ----- #
    N1, C1 = 64, 128
    x1 = jax.random.normal(k[0], (N1, C1), dtype=jnp.float32) * 2.0
    t1 = jax.random.bernoulli(k[1], p=0.3, shape=(N1, C1)).astype(jnp.float32)
    x2 = jax.random.normal(k[2], (N1, C1), dtype=jnp.float32) * 2.0
    t2 = jax.random.bernoulli(k[3], p=0.4, shape=(N1, C1)).astype(jnp.float32)

    # Small target_block_bytes -> tile_n=16 -> 4 row tiles: exercises both the
    # in-kernel chunk loop and the grid-level accumulation axis.
    loss_fn = GHMLossPallas(BINS, ALPHA, target_block_bytes=16 * C1 * 4)

    loss1 = jax.block_until_ready(loss_fn(x1, t1))   # first call: raw counts
    loss2 = jax.block_until_ready(loss_fn(x2, t2))   # second call: EMA branch

    ref_state = None
    ref1, ref_state = _reference_forward(x1, t1, BINS, ALPHA, ref_state)
    ref2, ref_state = _reference_forward(x2, t2, BINS, ALPHA, ref_state)
    np.testing.assert_allclose(np.asarray(loss1), np.asarray(ref1),
                               rtol=1e-4, atol=1e-5)
    np.testing.assert_allclose(np.asarray(loss2), np.asarray(ref2),
                               rtol=1e-4, atol=1e-5)

    # ---- Test 2: ragged rows (padding + mask) and lane (class) tiling -------- #
    N2, C2 = 36, 256          # rows not a multiple of 8; C tiled into 2x128
    x3 = jax.random.normal(k[4], (N2, C2), dtype=jnp.float32) * 2.0
    t3 = jax.random.bernoulli(k[5], p=0.5, shape=(N2, C2)).astype(jnp.float32)

    loss_fn2 = GHMLossPallas(BINS, ALPHA)
    loss3 = jax.block_until_ready(loss_fn2(x3, t3))
    ref3, _ = _reference_forward(x3, t3, BINS, ALPHA, None)
    np.testing.assert_allclose(np.asarray(loss3), np.asarray(ref3),
                               rtol=1e-4, atol=1e-5)

    print("KERNEL_OK")
</pallas_src>

<mosaic_0001>
module attributes {stable_mosaic.version = 11 : i64} {
  func.func @_ghm_stats_kernel(%arg0: i32, %arg1: i32, %arg2: i32, %arg3: memref<16x128xf32, #tpu.memory_space<vmem>>, %arg4: memref<16x128xf32, #tpu.memory_space<vmem>>, %arg5: memref<1x16x128xf32, #tpu.memory_space<vmem>>, %arg6: memref<1x16x128xf32, #tpu.memory_space<vmem>>) attributes {dimension_semantics = [#tpu.dimension_semantics<arbitrary>, #tpu.dimension_semantics<arbitrary>, #tpu.dimension_semantics<arbitrary>], iteration_bounds = array<i64: 1, 1, 4>, scalar_prefetch = 0 : i64, scratch_operands = 0 : i64, tpu.core_type = #tpu.core_type<tc>, window_params = [{transform_indices = @transform_0, window_bounds = array<i64: 16, 128>}, {transform_indices = @transform_1, window_bounds = array<i64: 16, 128>}, {transform_indices = @transform_2, window_bounds = array<i64: 1, 16, 128>}, {transform_indices = @transform_3, window_bounds = array<i64: 1, 16, 128>}]} {
    %c0_i32 = arith.constant 0 : i32
    %0 = arith.cmpi eq, %arg2, %c0_i32 : i32
    %1 = arith.extui %0 : i1 to i32
    %c0_i32_0 = arith.constant 0 : i32
    %2 = arith.cmpi ne, %1, %c0_i32_0 : i32
    scf.if %2 {
      %cst_35 = arith.constant 0.000000e+00 : f32
      %61 = vector.broadcast %cst_35 : f32 to vector<1x16x128xf32>
      %c0_36 = arith.constant 0 : index
      %c0_37 = arith.constant 0 : index
      %c0_38 = arith.constant 0 : index
      %62 = vector.load %arg5[%c0_36, %c0_37, %c0_38] : memref<1x16x128xf32, #tpu.memory_space<vmem>>, vector<1x16x128xf32>
      tpu.vector_store %arg5[%c0_36, %c0_37, %c0_38], %61 {strides = array<i32>} : memref<1x16x128xf32, #tpu.memory_space<vmem>>, vector<1x16x128xf32>,
      %cst_39 = arith.constant 0.000000e+00 : f32
      %63 = vector.broadcast %cst_39 : f32 to vector<1x16x128xf32>
      %c0_40 = arith.constant 0 : index
      %c0_41 = arith.constant 0 : index
      %c0_42 = arith.constant 0 : index
      %64 = vector.load %arg6[%c0_40, %c0_41, %c0_42] : memref<1x16x128xf32, #tpu.memory_space<vmem>>, vector<1x16x128xf32>
      tpu.vector_store %arg6[%c0_40, %c0_41, %c0_42], %63 {strides = array<i32>} : memref<1x16x128xf32, #tpu.memory_space<vmem>>, vector<1x16x128xf32>,
    } else {
    }
    %cst = arith.constant 0.000000e+00 : f32
    %3 = vector.broadcast %cst : f32 to vector<8x128xf32>
    %c0_i32_1 = arith.constant 0 : i32
    %c2_i32 = arith.constant 2 : i32
    %4 = arith.addi %c0_i32_1, %c2_i32 : i32
    %c1_i32 = arith.constant 1 : i32
    %5:20 = scf.for %arg7 = %c0_i32_1 to %4 step %c1_i32 iter_args(%arg8 = %3, %arg9 = %3, %arg10 = %3, %arg11 = %3, %arg12 = %3, %arg13 = %3, %arg14 = %3, %arg15 = %3, %arg16 = %3, %arg17 = %3, %arg18 = %3, %arg19 = %3, %arg20 = %3, %arg21 = %3, %arg22 = %3, %arg23 = %3, %arg24 = %3, %arg25 = %3, %arg26 = %3, %arg27 = %3) -> (vector<8x128xf32>, vector<8x128xf32>, vector<8x128xf32>, vector<8x128xf32>, vector<8x128xf32>, vector<8x128xf32>, vector<8x128xf32>, vector<8x128xf32>, vector<8x128xf32>, vector<8x128xf32>, vector<8x128xf32>, vector<8x128xf32>, vector<8x128xf32>, vector<8x128xf32>, vector<8x128xf32>, vector<8x128xf32>, vector<8x128xf32>, vector<8x128xf32>, vector<8x128xf32>, vector<8x128xf32>)  : i32 {
      %c8_i32 = arith.constant 8 : i32
      %61 = arith.muli %arg7, %c8_i32 : i32
      %62 = tpu.assume_multiple %61, 8 : i32
      %63 = arith.index_cast %62 : i32 to index
      %c0_35 = arith.constant 0 : index
      %64 = vector.load %arg3[%63, %c0_35] : memref<16x128xf32, #tpu.memory_space<vmem>>, vector<8x128xf32>
      %65 = arith.index_cast %62 : i32 to index
      %c0_36 = arith.constant 0 : index
      %66 = vector.load %arg4[%65, %c0_36] : memref<16x128xf32, #tpu.memory_space<vmem>>, vector<8x128xf32>
      %67 = math.absf %64 : vector<8x128xf32>
      %cst_37 = arith.constant 0.000000e+00 : f32
      %68 = vector.broadcast %cst_37 : f32 to vector<8x128xf32>
      %69 = arith.subf %68, %67 : vector<8x128xf32>
      %70 = math.exp %69 : vector<8x128xf32>
      %cst_38 = arith.constant 1.000000e+00 : f32
      %71 = vector.broadcast %cst_38 : f32 to vector<8x128xf32>
      %72 = arith.addf %71, %70 : vector<8x128xf32>
      %cst_39 = arith.constant 1.000000e+00 : f32
      %73 = vector.broadcast %cst_39 : f32 to vector<8x128xf32>
      %74 = arith.divf %73, %72 : vector<8x128xf32>
      %cst_40 = arith.constant 0.000000e+00 : f32
      %75 = vector.broadcast %cst_40 : f32 to vector<8x128xf32>
      %76 = arith.cmpf oge, %64, %75 : vector<8x128xf32>
      %cst_41 = arith.constant 1.000000e+00 : f32
      %77 = vector.broadcast %cst_41 : f32 to vector<8x128xf32>
      %78 = arith.subf %77, %74 : vector<8x128xf32>
      %79 = arith.select %76, %74, %78 : vector<8x128xi1>, vector<8x128xf32>
      %80 = arith.subf %79, %66 : vector<8x128xf32>
      %81 = math.absf %80 : vector<8x128xf32>
      %cst_42 = arith.constant 9.99989986 : f32
      %82 = vector.broadcast %cst_42 : f32 to vector<8x128xf32>
      %83 = arith.mulf %81, %82 : vector<8x128xf32>
      %84 = math.floor %83 : vector<8x128xf32>
      %85 = arith.fptosi %84 : vector<8x128xf32> to vector<8x128xi32>
      %cst_43 = arith.constant 0.000000e+00 : f32
      %86 = vector.broadcast %cst_43 : f32 to vector<8x128xf32>
      %87 = arith.maximumf %64, %86 : vector<8x128xf32>
      %88 = arith.mulf %64, %66 : vector<8x128xf32>
      %89 = arith.subf %87, %88 : vector<8x128xf32>
      %90 = math.log1p %70 : vector<8x128xf32>
      %91 = arith.addf %89, %90 : vector<8x128xf32>
      %c0_i32_44 = arith.constant 0 : i32
      %92 = vector.broadcast %c0_i32_44 : i32 to vector<8x128xi32>
      %93 = arith.cmpi eq, %85, %92 : vector<8x128xi32>
      %cst_45 = arith.constant 1.000000e+00 : f32
      %cst_46 = arith.constant 0.000000e+00 : f32
      %94 = vector.broadcast %cst_45 : f32 to vector<8x128xf32>
      %95 = vector.broadcast %cst_46 : f32 to vector<8x128xf32>
      %96 = arith.select %93, %94, %95 : vector<8x128xi1>, vector<8x128xf32>
      %97 = arith.addf %arg8, %96 : vector<8x128xf32>
      %98 = arith.mulf %96, %91 : vector<8x128xf32>
      %99 = arith.addf %arg18, %98 : vector<8x128xf32>
      %c1_i32_47 = arith.constant 1 : i32
      %100 = vector.broadcast %c1_i32_47 : i32 to vector<8x128xi32>
      %101 = arith.cmpi eq, %85, %100 : vector<8x128xi32>
      %cst_48 = arith.constant 1.000000e+00 : f32
      %cst_49 = arith.constant 0.000000e+00 : f32
      %102 = vector.broadcast %cst_48 : f32 to vector<8x128xf32>
      %103 = vector.broadcast %cst_49 : f32 to vector<8x128xf32>
      %104 = arith.select %101, %102, %103 : vector<8x128xi1>, vector<8x128xf32>
      %105 = arith.addf %arg9, %104 : vector<8x128xf32>
      %106 = arith.mulf %104, %91 : vector<8x128xf32>
      %107 = arith.addf %arg19, %106 : vector<8x128xf32>
      %c2_i32_50 = arith.constant 2 : i32
      %108 = vector.broadcast %c2_i32_50 : i32 to vector<8x128xi32>
      %109 = arith.cmpi eq, %85, %108 : vector<8x128xi32>
      %cst_51 = arith.constant 1.000000e+00 : f32
      %cst_52 = arith.constant 0.000000e+00 : f32
      %110 = vector.broadcast %cst_51 : f32 to vector<8x128xf32>
      %111 = vector.broadcast %cst_52 : f32 to vector<8x128xf32>
      %112 = arith.select %109, %110, %111 : vector<8x128xi1>, vector<8x128xf32>
      %113 = arith.addf %arg10, %112 : vector<8x128xf32>
      %114 = arith.mulf %112, %91 : vector<8x128xf32>
      %115 = arith.addf %arg20, %114 : vector<8x128xf32>
      %c3_i32 = arith.constant 3 : i32
      %116 = vector.broadcast %c3_i32 : i32 to vector<8x128xi32>
      %117 = arith.cmpi eq, %85, %116 : vector<8x128xi32>
      %cst_53 = arith.constant 1.000000e+00 : f32
      %cst_54 = arith.constant 0.000000e+00 : f32
      %118 = vector.broadcast %cst_53 : f32 to vector<8x128xf32>
      %119 = vector.broadcast %cst_54 : f32 to vector<8x128xf32>
      %120 = arith.select %117, %118, %119 : vector<8x128xi1>, vector<8x128xf32>
      %121 = arith.addf %arg11, %120 : vector<8x128xf32>
      %122 = arith.mulf %120, %91 : vector<8x128xf32>
      %123 = arith.addf %arg21, %122 : vector<8x128xf32>
      %c4_i32 = arith.constant 4 : i32
      %124 = vector.broadcast %c4_i32 : i32 to vector<8x128xi32>
      %125 = arith.cmpi eq, %85, %124 : vector<8x128xi32>
      %cst_55 = arith.constant 1.000000e+00 : f32
      %cst_56 = arith.constant 0.000000e+00 : f32
      %126 = vector.broadcast %cst_55 : f32 to vector<8x128xf32>
      %127 = vector.broadcast %cst_56 : f32 to vector<8x128xf32>
      %128 = arith.select %125, %126, %127 : vector<8x128xi1>, vector<8x128xf32>
      %129 = arith.addf %arg12, %128 : vector<8x128xf32>
      %130 = arith.mulf %128, %91 : vector<8x128xf32>
      %131 = arith.addf %arg22, %130 : vector<8x128xf32>
      %c5_i32 = arith.constant 5 : i32
      %132 = vector.broadcast %c5_i32 : i32 to vector<8x128xi32>
      %133 = arith.cmpi eq, %85, %132 : vector<8x128xi32>
      %cst_57 = arith.constant 1.000000e+00 : f32
      %cst_58 = arith.constant 0.000000e+00 : f32
      %134 = vector.broadcast %cst_57 : f32 to vector<8x128xf32>
      %135 = vector.broadcast %cst_58 : f32 to vector<8x128xf32>
      %136 = arith.select %133, %134, %135 : vector<8x128xi1>, vector<8x128xf32>
      %137 = arith.addf %arg13, %136 : vector<8x128xf32>
      %138 = arith.mulf %136, %91 : vector<8x128xf32>
      %139 = arith.addf %arg23, %138 : vector<8x128xf32>
      %c6_i32 = arith.constant 6 : i32
      %140 = vector.broadcast %c6_i32 : i32 to vector<8x128xi32>
      %141 = arith.cmpi eq, %85, %140 : vector<8x128xi32>
      %cst_59 = arith.constant 1.000000e+00 : f32
      %cst_60 = arith.constant 0.000000e+00 : f32
      %142 = vector.broadcast %cst_59 : f32 to vector<8x128xf32>
      %143 = vector.broadcast %cst_60 : f32 to vector<8x128xf32>
      %144 = arith.select %141, %142, %143 : vector<8x128xi1>, vector<8x128xf32>
      %145 = arith.addf %arg14, %144 : vector<8x128xf32>
      %146 = arith.mulf %144, %91 : vector<8x128xf32>
      %147 = arith.addf %arg24, %146 : vector<8x128xf32>
      %c7_i32 = arith.constant 7 : i32
      %148 = vector.broadcast %c7_i32 : i32 to vector<8x128xi32>
      %149 = arith.cmpi eq, %85, %148 : vector<8x128xi32>
      %cst_61 = arith.constant 1.000000e+00 : f32
      %cst_62 = arith.constant 0.000000e+00 : f32
      %150 = vector.broadcast %cst_61 : f32 to vector<8x128xf32>
      %151 = vector.broadcast %cst_62 : f32 to vector<8x128xf32>
      %152 = arith.select %149, %150, %151 : vector<8x128xi1>, vector<8x128xf32>
      %153 = arith.addf %arg15, %152 : vector<8x128xf32>
      %154 = arith.mulf %152, %91 : vector<8x128xf32>
      %155 = arith.addf %arg25, %154 : vector<8x128xf32>
      %c8_i32_63 = arith.constant 8 : i32
      %156 = vector.broadcast %c8_i32_63 : i32 to vector<8x128xi32>
      %157 = arith.cmpi eq, %85, %156 : vector<8x128xi32>
      %cst_64 = arith.constant 1.000000e+00 : f32
      %cst_65 = arith.constant 0.000000e+00 : f32
      %158 = vector.broadcast %cst_64 : f32 to vector<8x128xf32>
      %159 = vector.broadcast %cst_65 : f32 to vector<8x128xf32>
      %160 = arith.select %157, %158, %159 : vector<8x128xi1>, vector<8x128xf32>
      %161 = arith.addf %arg16, %160 : vector<8x128xf32>
      %162 = arith.mulf %160, %91 : vector<8x128xf32>
      %163 = arith.addf %arg26, %162 : vector<8x128xf32>
      %c9_i32 = arith.constant 9 : i32
      %164 = vector.broadcast %c9_i32 : i32 to vector<8x128xi32>
      %165 = arith.cmpi eq, %85, %164 : vector<8x128xi32>
      %cst_66 = arith.constant 1.000000e+00 : f32
      %cst_67 = arith.constant 0.000000e+00 : f32
      %166 = vector.broadcast %cst_66 : f32 to vector<8x128xf32>
      %167 = vector.broadcast %cst_67 : f32 to vector<8x128xf32>
      %168 = arith.select %165, %166, %167 : vector<8x128xi1>, vector<8x128xf32>
      %169 = arith.addf %arg17, %168 : vector<8x128xf32>
      %170 = arith.mulf %168, %91 : vector<8x128xf32>
      %171 = arith.addf %arg27, %170 : vector<8x128xf32>
      scf.yield %97, %105, %113, %121, %129, %137, %145, %153, %161, %169, %99, %107, %115, %123, %131, %139, %147, %155, %163, %171 : vector<8x128xf32>, vector<8x128xf32>, vector<8x128xf32>, vector<8x128xf32>, vector<8x128xf32>, vector<8x128xf32>, vector<8x128xf32>, vector<8x128xf32>, vector<8x128xf32>, vector<8x128xf32>, vector<8x128xf32>, vector<8x128xf32>, vector<8x128xf32>, vector<8x128xf32>, vector<8x128xf32>, vector<8x128xf32>, vector<8x128xf32>, vector<8x128xf32>, vector<8x128xf32>, vector<8x128xf32>
    }
    %c2_i32_2 = arith.constant 2 : i32
    %cst_3 = arith.constant dense<0.000000e+00> : vector<128xf32>
    %6 = vector.multi_reduction <add>, %5#0, %cst_3 [0] : vector<8x128xf32> to vector<128xf32>
    %7 = vector.shape_cast %6 : vector<128xf32> to vector<1x128xf32>
    %cst_4 = arith.constant dense<0.000000e+00> : vector<128xf32>
    %8 = vector.multi_reduction <add>, %5#1, %cst_4 [0] : vector<8x128xf32> to vector<128xf32>
    %9 = vector.shape_cast %8 : vector<128xf32> to vector<1x128xf32>
    %cst_5 = arith.constant dense<0.000000e+00> : vector<128xf32>
    %10 = vector.multi_reduction <add>, %5#2, %cst_5 [0] : vector<8x128xf32> to vector<128xf32>
    %11 = vector.shape_cast %10 : vector<128xf32> to vector<1x128xf32>
    %cst_6 = arith.constant dense<0.000000e+00> : vector<128xf32>
    %12 = vector.multi_reduction <add>, %5#3, %cst_6 [0] : vector<8x128xf32> to vector<128xf32>
    %13 = vector.shape_cast %12 : vector<128xf32> to vector<1x128xf32>
    %cst_7 = arith.constant dense<0.000000e+00> : vector<128xf32>
    %14 = vector.multi_reduction <add>, %5#4, %cst_7 [0] : vector<8x128xf32> to vector<128xf32>
    %15 = vector.shape_cast %14 : vector<128xf32> to vector<1x128xf32>
    %cst_8 = arith.constant dense<0.000000e+00> : vector<128xf32>
    %16 = vector.multi_reduction <add>, %5#5, %cst_8 [0] : vector<8x128xf32> to vector<128xf32>
    %17 = vector.shape_cast %16 : vector<128xf32> to vector<1x128xf32>
    %cst_9 = arith.constant dense<0.000000e+00> : vector<128xf32>
    %18 = vector.multi_reduction <add>, %5#6, %cst_9 [0] : vector<8x128xf32> to vector<128xf32>
    %19 = vector.shape_cast %18 : vector<128xf32> to vector<1x128xf32>
    %cst_10 = arith.constant dense<0.000000e+00> : vector<128xf32>
    %20 = vector.multi_reduction <add>, %5#7, %cst_10 [0] : vector<8x128xf32> to vector<128xf32>
    %21 = vector.shape_cast %20 : vector<128xf32> to vector<1x128xf32>
    %cst_11 = arith.constant dense<0.000000e+00> : vector<128xf32>
    %22 = vector.multi_reduction <add>, %5#8, %cst_11 [0] : vector<8x128xf32> to vector<128xf32>
    %23 = vector.shape_cast %22 : vector<128xf32> to vector<1x128xf32>
    %cst_12 = arith.constant dense<0.000000e+00> : vector<128xf32>
    %24 = vector.multi_reduction <add>, %5#9, %cst_12 [0] : vector<8x128xf32> to vector<128xf32>
    %25 = vector.shape_cast %24 : vector<128xf32> to vector<1x128xf32>
    %cst_13 = arith.constant dense<0.000000e+00> : vector<128xf32>
    %26 = vector.multi_reduction <add>, %5#10, %cst_13 [0] : vector<8x128xf32> to vector<128xf32>
    %27 = vector.shape_cast %26 : vector<128xf32> to vector<1x128xf32>
    %cst_14 = arith.constant dense<0.000000e+00> : vector<128xf32>
    %28 = vector.multi_reduction <add>, %5#11, %cst_14 [0] : vector<8x128xf32> to vector<128xf32>
    %29 = vector.shape_cast %28 : vector<128xf32> to vector<1x128xf32>
    %cst_15 = arith.constant dense<0.000000e+00> : vector<128xf32>
    %30 = vector.multi_reduction <add>, %5#12, %cst_15 [0] : vector<8x128xf32> to vector<128xf32>
    %31 = vector.shape_cast %30 : vector<128xf32> to vector<1x128xf32>
    %cst_16 = arith.constant dense<0.000000e+00> : vector<128xf32>
    %32 = vector.multi_reduction <add>, %5#13, %cst_16 [0] : vector<8x128xf32> to vector<128xf32>
    %33 = vector.shape_cast %32 : vector<128xf32> to vector<1x128xf32>
    %cst_17 = arith.constant dense<0.000000e+00> : vector<128xf32>
    %34 = vector.multi_reduction <add>, %5#14, %cst_17 [0] : vector<8x128xf32> to vector<128xf32>
    %35 = vector.shape_cast %34 : vector<128xf32> to vector<1x128xf32>
    %cst_18 = arith.constant dense<0.000000e+00> : vector<128xf32>
    %36 = vector.multi_reduction <add>, %5#15, %cst_18 [0] : vector<8x128xf32> to vector<128xf32>
    %37 = vector.shape_cast %36 : vector<128xf32> to vector<1x128xf32>
    %cst_19 = arith.constant dense<0.000000e+00> : vector<128xf32>
    %38 = vector.multi_reduction <add>, %5#16, %cst_19 [0] : vector<8x128xf32> to vector<128xf32>
    %39 = vector.shape_cast %38 : vector<128xf32> to vector<1x128xf32>
    %cst_20 = arith.constant dense<0.000000e+00> : vector<128xf32>
    %40 = vector.multi_reduction <add>, %5#17, %cst_20 [0] : vector<8x128xf32> to vector<128xf32>
    %41 = vector.shape_cast %40 : vector<128xf32> to vector<1x128xf32>
    %cst_21 = arith.constant dense<0.000000e+00> : vector<128xf32>
    %42 = vector.multi_reduction <add>, %5#18, %cst_21 [0] : vector<8x128xf32> to vector<128xf32>
    %43 = vector.shape_cast %42 : vector<128xf32> to vector<1x128xf32>
    %cst_22 = arith.constant dense<0.000000e+00> : vector<128xf32>
    %44 = vector.multi_reduction <add>, %5#19, %cst_22 [0] : vector<8x128xf32> to vector<128xf32>
    %45 = vector.shape_cast %44 : vector<128xf32> to vector<1x128xf32>
    %cst_23 = arith.constant 0.000000e+00 : f32
    %46 = vector.broadcast %cst_23 : f32 to vector<6x128xf32>
    %c0 = arith.constant 0 : index
    %c0_24 = arith.constant 0 : index
    %c0_25 = arith.constant 0 : index
    %47 = vector.load %arg5[%c0, %c0_24, %c0_25] : memref<1x16x128xf32, #tpu.memory_space<vmem>>, vector<1x16x128xf32>
    %48 = vector.shape_cast %47 : vector<1x16x128xf32> to vector<16x128xf32>
    %49 = tpu.concatenate %7, %9, %11, %13, %15, %17, %19, %21, %23, %25, %46 in 0 : vector<1x128xf32>, vector<1x128xf32>, vector<1x128xf32>, vector<1x128xf32>, vector<1x128xf32>, vector<1x128xf32>, vector<1x128xf32>, vector<1x128xf32>, vector<1x128xf32>, vector<1x128xf32>, vector<6x128xf32> -> vector<16x128xf32>
    %50 = arith.addf %48, %49 : vector<16x128xf32>
    %c0_26 = arith.constant 0 : index
    %c0_27 = arith.constant 0 : index
    %c0_28 = arith.constant 0 : index
    %51 = vector.load %arg5[%c0_26, %c0_27, %c0_28] : memref<1x16x128xf32, #tpu.memory_space<vmem>>, vector<1x16x128xf32>
    %52 = vector.shape_cast %51 : vector<1x16x128xf32> to vector<16x128xf32>
    %53 = vector.shape_cast %50 : vector<16x128xf32> to vector<1x16x128xf32>
    tpu.vector_store %arg5[%c0_26, %c0_27, %c0_28], %53 {strides = array<i32>} : memref<1x16x128xf32, #tpu.memory_space<vmem>>, vector<1x16x128xf32>,
    %c0_29 = arith.constant 0 : index
    %c0_30 = arith.constant 0 : index
    %c0_31 = arith.constant 0 : index
    %54 = vector.load %arg6[%c0_29, %c0_30, %c0_31] : memref<1x16x128xf32, #tpu.memory_space<vmem>>, vector<1x16x128xf32>
    %55 = vector.shape_cast %54 : vector<1x16x128xf32> to vector<16x128xf32>
    %56 = tpu.concatenate %27, %29, %31, %33, %35, %37, %39, %41, %43, %45, %46 in 0 : vector<1x128xf32>, vector<1x128xf32>, vector<1x128xf32>, vector<1x128xf32>, vector<1x128xf32>, vector<1x128xf32>, vector<1x128xf32>, vector<1x128xf32>, vector<1x128xf32>, vector<1x128xf32>, vector<6x128xf32> -> vector<16x128xf32>
    %57 = arith.addf %55, %56 : vector<16x128xf32>
    %c0_32 = arith.constant 0 : index
    %c0_33 = arith.constant 0 : index
    %c0_34 = arith.constant 0 : index
    %58 = vector.load %arg6[%c0_32, %c0_33, %c0_34] : memref<1x16x128xf32, #tpu.memory_space<vmem>>, vector<1x16x128xf32>
    %59 = vector.shape_cast %58 : vector<1x16x128xf32> to vector<16x128xf32>
    %60 = vector.shape_cast %57 : vector<16x128xf32> to vector<1x16x128xf32>
    tpu.vector_store %arg6[%c0_32, %c0_33, %c0_34], %60 {strides = array<i32>} : memref<1x16x128xf32, #tpu.memory_space<vmem>>, vector<1x16x128xf32>,
    return
  }
  func.func @transform_0(%arg0: i32, %arg1: i32, %arg2: i32) -> (i32, i32) {
    %c4_i32 = arith.constant 4 : i32
    %0 = arith.muli %arg0, %c4_i32 : i32
    %1 = arith.addi %0, %arg2 : i32
    %c0_i32 = arith.constant 0 : i32
    return %1, %arg1 : i32, i32
  }
  func.func @transform_1(%arg0: i32, %arg1: i32, %arg2: i32) -> (i32, i32) {
    %c4_i32 = arith.constant 4 : i32
    %0 = arith.muli %arg0, %c4_i32 : i32
    %1 = arith.addi %0, %arg2 : i32
    %c0_i32 = arith.constant 0 : i32
    return %1, %arg1 : i32, i32
  }
  func.func @transform_2(%arg0: i32, %arg1: i32, %arg2: i32) -> (i32, i32, i32) {
    %c0_i32 = arith.constant 0 : i32
    %c0_i32_0 = arith.constant 0 : i32
    return %arg0, %c0_i32, %arg1 : i32, i32, i32
  }
  func.func @transform_3(%arg0: i32, %arg1: i32, %arg2: i32) -> (i32, i32, i32) {
    %c0_i32 = arith.constant 0 : i32
    %c0_i32_0 = arith.constant 0 : i32
    return %arg0, %c0_i32, %arg1 : i32, i32, i32
  }
}

</mosaic_0001>

<bundles_post_ra>
// kernel: tpu_custom_call.1
= control target key start
LH: loop header
LB: loop body
LE: loop exit
PB: predicated region body
PF: predicated region fallthrough
CT: control target
= control target key end

     0   :  { %9 = vsyncpa [#allocation3], 0  ;;  %s1845_s0 = inlined_call_operand.hbm [shape: f32[64,128], index: 0, kind: input, shape index: {}]   ;;  %s1846_s1 = inlined_call_operand.hbm [shape: f32[64,128], index: 1, kind: input, shape index: {}]   ;;  %s1847_s2 = inlined_call_operand.hbm [shape: f32[1,16,128], index: 2, kind: output, shape index: {0}]   ;;  %s1848_s3 = inlined_call_operand.hbm [shape: f32[1,16,128], index: 3, kind: output, shape index: {1}]  }
   0x1   :  { %11 = vsyncpa [#allocation3 + $0x1], 0 }
   0x2   :  { %12 = vsyncpa [#allocation6], 0 }
   0x3   :  { %14 = vsyncpa [#allocation6 + $0x1], 0 }
   0x4   :  { %15 = vsyncpa [#allocation4], 0 }
   0x5   :  { %16 = vsyncpa [#allocation9], 0  ;;  %s1433_s12 = smov 0   ;;  %s1435_s13 = smov 0  }
   0x6   :  { %s1437_s14 = smov 0   ;;  %s1439_s15 = smov 0  }
   0x7   :  { %s1441_s16 = smov 0   ;;  %s1443_s17 = smov 0  }
   0x8 LB: > { %s1849_s18 = sadd.s32 4294967295, %s1319_s17   ;;  %s34_s19 = sadd.s32 1, %s1315_s16  ;;  %s1319_s17 = sphi %s1443_s17, %s22_s17   ;;  %s1315_s16 = sphi %s1441_s16, %s1896_s16   ;;  %s1311_s15 = sphi %s1439_s15, %s1895_s15   ;;  %s1307_s14 = sphi %s1437_s14, %s1894_s14   ;;  %s1303_s13 = sphi %s1435_s13, %s1893_s13   ;;  %s1299_s12 = sphi %s1433_s12, %s1892_s12  }
   0x9   : > { %p35_p0 = scmp.ge.s32.totalorder %s34_s19, 4  ;;  %s54_s20 = sadd.s32 1, %s1307_s14 }
   0xa   : > { %p61_p1 = scmp.ne.s32.totalorder %s1307_s14, %s1303_s13  ;;  %p62_p2 = scmp.eq.s32.totalorder %s1319_s17, 0 }
   0xb   : > { %s1898_s19 = smov (%p35_p0, %s34_s19), 0  ;;  %p67_p4 = scmp.ne.s32.totalorder %s1303_s13, %s1299_s12 }
   0xc   : > { %p1469_p3 = por %p62_p2, %p61_p1  ;;  %s49_s22 = ssub.s32 %s1315_s16, %s1898_s19 }
   0xd   : > { %p68_p5 = scmp.eq.s32.totalorder %s1849_s18, 0  ;;  %p52_p6 = scmp.eq.s32.totalorder %s49_s22, 0 }
   0xe   : > { %p822_p8 = scmp.lt.s32.totalorder %s1319_s17, 4  ;;  %s1487_s25 = sand.u32 1, %s1307_s14  }
   0xf   : > { %p1478_p7 = por %p68_p5, %p67_p4  ;;  %s799_s26 = sshll.u32 %s1315_s16, 4 }
  0x10   : > { %s1484_s24 = scalar_select %p52_p6, %s1307_s14, %s54_s20  }
  0x11   : > { %s782_s27 = sshll.u32 %s1487_s25, 4  ;;  %s191_s30 = scalar_lea.hbm %s1845_s0, %s799_s26 }
  0x12   : > { %s192_s4 = sshll.u32 %s191_s30, 4  ;;  %s183_s5 = scalar_lea.vmem [#allocation2], %s782_s27  ;;  %s193_s4 = int_to_ptr.hbm [resolvable:$true] %s192_s4 }
  0x13   : > { %s194_s6 = sshll.u32 %s183_s5, 4  ;;  %p1496_p9 = pnand %p822_p8, %p1469_p3  ;;  %s195_s6 = int_to_ptr.vmem [resolvable:$true] %s194_s6 }
  0x14   : > { %p788_p10 = scmp.ge.s32.totalorder %s1319_s17, 1  ;;  %p227_p11 = scmp.lt.s32.totalorder %s1319_s17, 5 }
  0x15   : > { %s180_s8 = scalar_lea.sflag [#allocation3], %s1487_s25  ;;  %s1405_s9 = smov 128  }
  0x16   : > { %s1406_s10 = smov 8   ;;  %p228_p12 = pnand %p788_p10, %p227_p11 }
  0x17   : > { %818 = dma.hbm_to_vmem [thread:$0]  (!%p1496_p9), %s193_s4, 256, %s195_s6, %s180_s8, %s1405_s9, %s1405_s9, %s1406_s10  }
  0x18   : > { %s216_s20 = scalar_lea.hbm %s1846_s1, %s799_s26  ;;  %s208_s21 = scalar_lea.vmem [#allocation5], %s782_s27 }
  0x19   : > { %s217_s22 = sshll.u32 %s216_s20, 4  ;;  %s219_s28 = sshll.u32 %s208_s21, 4  ;;  %s218_s22 = int_to_ptr.hbm [resolvable:$true] %s217_s22  ;;  %s220_s28 = int_to_ptr.vmem [resolvable:$true] %s219_s28 }
  0x1a   : > { %s205_s29 = scalar_lea.sflag [#allocation6], %s1487_s25  ;;  %231 = sbr.rel (%p228_p12) target bundleno = 170 (0xaa), region = 28 }
  0x1b   : > { %821 = dma.hbm_to_vmem [thread:$0]  (!%p1496_p9), %s218_s22, 256, %s220_s28, %s205_s29, %s1405_s9, %s1405_s9, %s1406_s10  }
  0x1c   : > { %s233_s30 = sand.u32 (!%p228_p12), 1, %s1303_s13  }
  0x1d   : > { %s789_s5 = sshll.u32 (!%p228_p12), %s233_s30, 4  ;;  %s234_s18 = scalar_lea.sflag (!%p228_p12), [#allocation3], %s233_s30 }
  0x1e   : > { %s1512_s4 = scalar_lea.vmem (!%p228_p12), [#allocation2], %s789_s5 }
  0x1f   : > { %1282 = dma.done.wait (%p1478_p7), %s234_s18, 256  }
  0x20   : > { %1284 = vsyncadd (%p1478_p7), %s234_s18, 4294967040  ;;  %s244_s26 = scalar_lea.sflag [#allocation6], %s233_s30  ;;  %s1518_s27 = scalar_lea.vmem [#allocation5], %s789_s5 }
  0x21   : > { %1286 = dma.done.wait (%p1478_p7), %s244_s26, 256  }
  0x22   : > { %1288 = vsyncadd (%p1478_p7), %s244_s26, 4294967040  ;;  %p791_p13 = scmp.ne.s32.totalorder %s1311_s15, 0 }
  0x24   : > { %280 = sbr.rel (%p791_p13) target bundleno = 46 (0x2e), region = 40 }
  0x29   : > { %v1407_v0 = vmov 0.0  }
  0x2a   : > { %281 = vst [vmem:[#allocation7] sm:$0xff] %v1407_v0 }
  0x2b   : > { %282 = vst [vmem:[#allocation7 + $0x8] sm:$0xff] %v1407_v0 }
  0x2c   : > { %283 = vst [vmem:[#allocation8] sm:$0xff] %v1407_v0 }
  0x2d   : > { %284 = vst [vmem:[#allocation8 + $0x8] sm:$0xff] %v1407_v0 }
  0x2e PF: > { %v1525_v1 = vmov 0.0   ;;  %v1527_v2 = vmov 0.0   ;;  %v1529_v3 = vmov 0.0   ;;  %v1531_v4 = vmov 0.0   ;;  %s1565_s15 = smov 0  }
  0x2f   : > { %v1533_v5 = vmov 0.0   ;;  %v1535_v6 = vmov 0.0   ;;  %v1537_v7 = vmov 0.0   ;;  %v1539_v8 = vmov 0.0  }
  0x30   : > { %v1541_v9 = vmov 0.0   ;;  %v1543_v10 = vmov 0.0   ;;  %v1545_v11 = vmov 0.0   ;;  %v1547_v12 = vmov 0.0  }
  0x31   : > { %v1549_v13 = vmov 0.0   ;;  %v1551_v14 = vmov 0.0   ;;  %v1553_v15 = vmov 0.0   ;;  %v1555_v16 = vmov 0.0  }
  0x32   : > { %v1557_v17 = vmov 0.0   ;;  %v1559_v18 = vmov 0.0   ;;  %v1561_v19 = vmov 0.0   ;;  %v1563_v20 = vmov 0.0  }
  0x33 LB: >> { %s792_s18 = sshll.u32 %s1403_s15, 3  ;;  %v1408_v56 = vmov 0.0   ;;  %s290_s15 = sadd.s32 1, %s1403_s15   ;;  %s1403_s15 = sphi %s1565_s15, %s290_s15   ;;  %v1399_v20 = vphi %v1563_v20, %v1889_v20   ;;  %v1395_v19 = vphi %v1561_v19, %v1888_v19   ;;  %v1391_v18 = vphi %v1559_v18, %v1887_v18   ;;  %v1387_v17 = vphi %v1557_v17, %v1886_v17   ;;  %v1383_v16 = vphi %v1555_v16, %v1885_v16   ;;  %v1379_v15 = vphi %v1553_v15, %v1884_v15   ;;  %v1375_v14 = vphi %v1551_v14, %v1883_v14   ;;  %v1371_v13 = vphi %v1549_v13, %v1882_v13   ;;  %v1367_v12 = vphi %v1547_v12, %v1881_v12   ;;  %v1363_v11 = vphi %v1545_v11, %v1880_v11   ;;  %v1359_v10 = vphi %v1543_v10, %v1879_v10   ;;  %v1355_v9 = vphi %v1541_v9, %v1878_v9   ;;  %v1351_v8 = vphi %v1539_v8, %v1877_v8   ;;  %v1347_v7 = vphi %v1537_v7, %v1876_v7   ;;  %v1343_v6 = vphi %v1535_v6, %v1875_v6   ;;  %v1339_v5 = vphi %v1533_v5, %v1874_v5   ;;  %v1335_v4 = vphi %v1531_v4, %v1873_v4   ;;  %v1331_v3 = vphi %v1529_v3, %v1872_v3   ;;  %v1327_v2 = vphi %v1527_v2, %v1871_v2   ;;  %v1323_v1 = vphi %v1525_v1, %v1870_v1  }
  0x34   : >> { %s312_s23 = scalar_lea.vmem %s1512_s4, %s792_s18 [#allocation2]  ;;  %s314_s25 = scalar_lea.vmem %s1518_s27, %s792_s18 [#allocation5] }
  0x35   : >> { %v313_v21 = vld [vmem:[%s312_s23] sm:$0xff]  ;;  %p1680_p0 = scmp.ge.s32.totalorder %s290_s15, 2  }
  0x36   : >> { %v316_v22 = vand.u32 2147483647, %v313_v21  ;;  %vm336_vm4 = vcmp.ge.f32.partialorder %v313_v21, 0.0  ;;  %v315_v38 = vld [vmem:[%s314_s25] sm:$0xff]  ;;  %v344_v45 = vmax.f32 %v313_v21, 0.0  ;;  %s1409_s7 = smov (%p1680_p0), [#allocation7]  }
  0x37   : >> { %v345_v46 = vmul.f32 %v315_v38, %v313_v21  ;;  %s1775_s8 = sshll.u32 (%p1680_p0), %s1409_s7, 4  ;;  %s575_s11 = sshll.u32 (%p1680_p0), %s1847_s2, 4  ;;  %s574_s8 = int_to_ptr.vmem [resolvable:$true] %s1775_s8  ;;  %s576_s11 = int_to_ptr.hbm [resolvable:$true] %s575_s11 }
  0x38   : >> { %v317_v23 = vsub.f32 0.0, %v316_v22  ;;  %s1890_s12 = sadd.s32 (%p1680_p0), 4294967295, %s1319_s17   ;;  %s1410_s22 = smov (%p1680_p0), 128  }
  0x39   : >> { %v346_v51 = vsub.f32 %v344_v45, %v345_v46  ;;  %p1785_p1 = scmp.eq.s32.totalorder (%p1680_p0), %s1890_s12, 3  ;;  %s1411_s21 = smov (%p1680_p0), 8  }
  0x3a   : >> { %v318_v24 = vmul.f32 1.442695, %v317_v23  ;;  %s1412_s28 = smov (%p1680_p0), [#allocation8]   ;;  %s593_s4 = sshll.u32 (%p1680_p0), %s1848_s3, 4  ;;  %s594_s4 = int_to_ptr.hbm [resolvable:$true] %s593_s4 }
  0x3b   : > { %s591_s29 = sshll.u32 (%p1680_p0), %s1412_s28, 4  ;;  %s592_s29 = int_to_ptr.vmem [resolvable:$true] %s591_s29 }
  0x3c   : >> { %1051 = vpow2.f32 %v318_v24 }
  0x42   : >> { %v1052_v25 = vpop.eup %1051 }
  0x43   : >> { %v320_v26 = vadd.f32 1.0, %v1052_v25  ;;  %v350_v35 = vmul.f32 -0.5, %v1052_v25  ;;  %v353_v42 = vand.u32 2147483647, %v1052_v25 }
  0x45   : >> { %1053 = vrcp.f32 %v320_v26  ;;  %v332_v29 = vand.u32 2147483648, %v320_v26  ;;  %vm326_vm0 = vweird.f32 %v320_v26  ;;  %v330_v31 = vand.u32 2147483647, %v320_v26 }
  0x46   : >> { %1055 = vlog2.f32 %v320_v26  ;;  %v351_v40 = vadd.f32 1.0, %v350_v35  ;;  %vm354_vm5 = vcmp.lt.f32.partialorder %v353_v42, 0.0004427343 }
  0x47   : >> { %v333_v33 = vor.u32 1.1754944e-38, %v332_v29  ;;  %vm331_vm3 = vcmp.eq.f32.partialorder %v330_v31, 8.507059e+37 }
  0x48   : >> { %v352_v48 = vmul.f32 %v1052_v25, %v351_v40 }
  0x4b   : >> { %v1054_v27 = vpop.eup %1053 }
  0x4c   : >> { %v322_v28 = vmul.f32 %v1054_v27, %v320_v26  ;;  %vm327_vm1 = vweird.f32 %v1054_v27  ;;  %v1056_v41 = vpop.eup %1055 }
  0x4d   : >> { %vm328_vm2 = vmor %vm326_vm0, %vm327_vm1  ;;  %v349_v47 = vmul.f32 0.6931472, %v1056_v41  ;;  %vm529_vm0 = vcmask (%p1680_p0), 1040384   ;;  %vm531_vm1 = vcmask (%p1680_p0), 1041408  }
  0x4e   : >> { %v323_v30 = vsub.f32 1.0, %v322_v28 }
  0x4f   : >> { %v355_v52 = vsel %vm354_vm5, %v352_v48, %v349_v47  ;;  %vm539_vm5 = vcmask (%p1680_p0), 1045504  }
  0x50   : >> { %v324_v32 = vmul.f32 %v1054_v27, %v323_v30  ;;  %v356_v55 = vadd.f32 %v355_v52, %v346_v51 }
  0x52   : >> { %v325_v34 = vadd.f32 %v1054_v27, %v324_v32 }
  0x54   : >> { %v329_v36 = vsel %vm328_vm2, %v1054_v27, %v325_v34  ;;  %vm533_vm2 = vcmask (%p1680_p0), 1042432  }
  0x55   : >> { %v334_v37 = vsel %vm331_vm3, %v333_v33, %v329_v36  ;;  %vm535_vm3 = vcmask (%p1680_p0), 1043456  }
  0x56   : >> { %v337_v39 = vsub.f32 1.0, %v334_v37 }
  0x58   : >> { %v338_v43 = vsel %vm336_vm4, %v334_v37, %v337_v39  ;;  %vm537_vm4 = vcmask (%p1680_p0), 1044480  }
  0x59   : >> { %v339_v44 = vsub.f32 %v338_v43, %v315_v38 }
  0x5b   : >> { %v340_v49 = vand.u32 2147483647, %v339_v44 }
  0x5d   : >> { %v341_v50 = vmul.f32 9.9999, %v340_v49 }
  0x5f   : >> { %v342_v53 = vfloor.f32 %v341_v50 }
  0x61   : >> { %v802_v54 = vcvt.f32.s32 %v342_v53 }
  0x63   : >> { %vm357_vm6 = vcmp.eq.s32.totalorder %v802_v54, 0  ;;  %vm362_vm7 = vcmp.eq.s32.totalorder %v802_v54, 1  ;;  %vm367_vm8 = vcmp.eq.s32.totalorder %v802_v54, 2  ;;  %vm372_vm9 = vcmp.eq.s32.totalorder %v802_v54, 3 }
  0x64   : >> { %v358_v57 = vsel %vm357_vm6, 1.0, %v1408_v56  ;;  %v363_v58 = vsel %vm362_vm7, 1.0, %v1408_v56  ;;  %v368_v59 = vsel %vm367_vm8, 1.0, %v1408_v56  ;;  %v373_v60 = vsel %vm372_vm9, 1.0, %v1408_v56 }
  0x65   : >> { %v1629_v20 = vadd.f32 %v1399_v20, %v358_v57   ;;  %v360_v62 = vmul.f32 %v358_v57, %v356_v55  ;;  %v1631_v19 = vadd.f32 %v1395_v19, %v363_v58   ;;  %v365_v0 = vmul.f32 %v363_v58, %v356_v55 }
  0x66   : >> { %v1634_v18 = vadd.f32 %v1391_v18, %v368_v59   ;;  %v370_v22 = vmul.f32 %v368_v59, %v356_v55  ;;  %v1637_v17 = vadd.f32 %v1387_v17, %v373_v60   ;;  %v375_v24 = vmul.f32 %v373_v60, %v356_v55 }
  0x67   : >> { %v1853_v61 = vmov %v1629_v20  ;;  %v1854_v63 = vmov %v1631_v19  ;;  %v1640_v10 = vadd.f32 %v1359_v10, %v360_v62   ;;  %v1643_v9 = vadd.f32 %v1355_v9, %v365_v0  }
  0x68   : >> { %v1855_v21 = vmov %v1634_v18  ;;  %v1856_v23 = vmov %v1637_v17  ;;  %vm377_vm10 = vcmp.eq.s32.totalorder %v802_v54, 4  ;;  %vm382_vm11 = vcmp.eq.s32.totalorder %v802_v54, 5 }
  0x69   : >> { %v1857_v25 = vmov %v1640_v10  ;;  %v1858_v26 = vmov %v1643_v9  ;;  %v1646_v8 = vadd.f32 %v1351_v8, %v370_v22   ;;  %v1649_v7 = vadd.f32 %v1347_v7, %v375_v24  }
  0x6a   : >> { %v378_v18 = vsel %vm377_vm10, 1.0, %v1408_v56  ;;  %v383_v19 = vsel %vm382_vm11, 1.0, %v1408_v56  ;;  %vm387_vm12 = vcmp.eq.s32.totalorder %v802_v54, 6  ;;  %vm392_vm13 = vcmp.eq.s32.totalorder %v802_v54, 7 }
  0x6b   : >> { %v1859_v27 = vmov %v1646_v8  ;;  %v1860_v28 = vmov %v1649_v7  ;;  %v379_v29 = vadd.f32 %v1383_v16, %v378_v18   ;;  %v380_v17 = vmul.f32 %v378_v18, %v356_v55 }
  0x6c   : >> { %v384_v30 = vadd.f32 %v1379_v15, %v383_v19   ;;  %v385_v20 = vmul.f32 %v383_v19, %v356_v55  ;;  %vm397_vm14 = vcmp.eq.s32.totalorder %v802_v54, 8  ;;  %vm402_vm15 = vcmp.eq.s32.totalorder %v802_v54, 9 }
  0x6d   : >> { %v1654_v6 = vadd.f32 %v1343_v6, %v380_v17   ;;  %v388_v8 = vsel %vm387_vm12, 1.0, %v1408_v56  ;;  %v393_v7 = vsel %vm392_vm13, 1.0, %v1408_v56  ;;  %v398_v15 = vsel %vm397_vm14, 1.0, %v1408_v56 }
  0x6e   : >> { %v1657_v5 = vadd.f32 %v1339_v5, %v385_v20   ;;  %v389_v33 = vadd.f32 %v1375_v14, %v388_v8   ;;  %v390_v9 = vmul.f32 %v388_v8, %v356_v55  ;;  %v394_v34 = vadd.f32 %v1371_v13, %v393_v7  }
  0x6f   : >> { %v1861_v31 = vmov %v1654_v6  ;;  %v395_v10 = vmul.f32 %v393_v7, %v356_v55  ;;  %v403_v16 = vsel %vm402_vm15, 1.0, %v1408_v56  ;;  %v1668_v12 = vadd.f32 %v1367_v12, %v398_v15  }
  0x70   : >> { %v1862_v32 = vmov %v1657_v5  ;;  %v1662_v4 = vadd.f32 %v1335_v4, %v390_v9   ;;  %v400_v5 = vmul.f32 %v398_v15, %v356_v55  ;;  %v1671_v11 = vadd.f32 %v1363_v11, %v403_v16  }
  0x71   : >> { %v1665_v3 = vadd.f32 %v1331_v3, %v395_v10   ;;  %v1865_v37 = vmov %v1668_v12  ;;  %v405_v6 = vmul.f32 %v403_v16, %v356_v55  ;;  %v1876_v7 = vmov %v1860_v28 }
  0x72   : >> { %v1863_v35 = vmov %v1662_v4  ;;  %v1866_v38 = vmov %v1671_v11  ;;  %v1674_v2 = vadd.f32 %v1327_v2, %v400_v5   ;;  %v1874_v5 = vmov %v1862_v32 }
  0x73   : >> { %v1864_v36 = vmov %v1665_v3  ;;  %v1677_v1 = vadd.f32 %v1323_v1, %v405_v6   ;;  %v1873_v4 = vmov %v1863_v35  ;;  %v1875_v6 = vmov %v1861_v31 }
  0x74   : >> { %v1867_v39 = vmov %v1674_v2  ;;  %v1872_v3 = vmov %v1864_v36  ;;  %v1877_v8 = vmov %v1859_v27  ;;  %v1878_v9 = vmov %v1858_v26  ;;  %289 = sbr.rel (!%p1680_p0) target bundleno = 51 (0x33), region = 101 }
  0x75   : >> { %v1868_v40 = vmov %v1677_v1  ;;  %v1871_v2 = vmov %v1867_v39  ;;  %v1879_v10 = vmov %v1857_v25  ;;  %v1880_v11 = vmov %v1866_v38 }
  0x76   : >> { %v1870_v1 = vmov %v1868_v40  ;;  %v1881_v12 = vmov %v1865_v37  ;;  %v1882_v13 = vmov %v394_v34  ;;  %v1883_v14 = vmov %v389_v33 }
  0x77   : >> { %v1884_v15 = vmov %v384_v30  ;;  %v1885_v16 = vmov %v379_v29  ;;  %v1886_v17 = vmov %v1856_v23  ;;  %v1887_v18 = vmov %v1855_v21 }
  0x78   : >> { %v1888_v19 = vmov %v1854_v63  ;;  %v1889_v20 = vmov %v1853_v61  ;;  %v407_v41 = vrot.slane (%p1680_p0), %v1853_v61, 4  ;;  %v413_v42 = vrot.slane (%p1680_p0), %v1854_v63, 4 }
  0x79   : > { %v419_v43 = vrot.slane %v1855_v21, 4  ;;  %v425_v44 = vrot.slane %v1856_v23, 4  ;;  %v431_v45 = vrot.slane %v379_v29, 4  ;;  %v437_v46 = vrot.slane %v384_v30, 4 }
  0x7a   : > { %v443_v47 = vrot.slane %v389_v33, 4  ;;  %v449_v48 = vrot.slane %v394_v34, 4  ;;  %v408_v49 = vadd.f32 %v407_v41, %v1853_v61  ;;  %v414_v50 = vadd.f32 %v413_v42, %v1854_v63 }
  0x7b   : > { %v420_v51 = vadd.f32 %v419_v43, %v1855_v21  ;;  %v426_v52 = vadd.f32 %v425_v44, %v1856_v23  ;;  %v432_v1 = vadd.f32 %v431_v45, %v379_v29  ;;  %v438_v2 = vadd.f32 %v437_v46, %v384_v30 }
  0x7c   : > { %v444_v3 = vadd.f32 %v443_v47, %v389_v33  ;;  %v450_v4 = vadd.f32 %v449_v48, %v394_v34  ;;  %v409_v11 = vrot.slane %v408_v49, 2  ;;  %v415_v12 = vrot.slane %v414_v50, 2 }
  0x7d   : > { %v421_v13 = vrot.slane %v420_v51, 2  ;;  %v427_v14 = vrot.slane %v426_v52, 2  ;;  %v433_v53 = vrot.slane %v432_v1, 2  ;;  %v439_v54 = vrot.slane %v438_v2, 2 }
  0x7e   : > { %v445_v55 = vrot.slane %v444_v3, 2  ;;  %v451_v56 = vrot.slane %v450_v4, 2  ;;  %v410_v57 = vadd.f32 %v409_v11, %v408_v49  ;;  %v416_v58 = vadd.f32 %v415_v12, %v414_v50  ;;  %v527_v50 = vld [vmem:[#allocation7] sm:$0xff] }
  0x7f   : > { %v422_v59 = vadd.f32 %v421_v13, %v420_v51  ;;  %v428_v60 = vadd.f32 %v427_v14, %v426_v52  ;;  %v434_v61 = vadd.f32 %v433_v53, %v432_v1  ;;  %v440_v62 = vadd.f32 %v439_v54, %v438_v2 }
  0x80   : > { %v446_v63 = vadd.f32 %v445_v55, %v444_v3  ;;  %v452_v0 = vadd.f32 %v451_v56, %v450_v4  ;;  %v411_v21 = vrot.slane %v410_v57, 1  ;;  %v417_v22 = vrot.slane %v416_v58, 1 }
  0x81   : > { %v423_v23 = vrot.slane %v422_v59, 1  ;;  %v429_v24 = vrot.slane %v428_v60, 1  ;;  %v435_v18 = vrot.slane %v434_v61, 1  ;;  %v441_v19 = vrot.slane %v440_v62, 1 }
  0x82   : > { %v447_v29 = vrot.slane %v446_v63, 1  ;;  %v453_v17 = vrot.slane %v452_v0, 1  ;;  %v412_v30 = vadd.f32 %v411_v21, %v410_v57  ;;  %v418_v20 = vadd.f32 %v417_v22, %v416_v58 }
  0x83   : > { %v424_v8 = vadd.f32 %v423_v23, %v422_v59  ;;  %v430_v7 = vadd.f32 %v429_v24, %v428_v60  ;;  %v436_v33 = vadd.f32 %v435_v18, %v434_v61  ;;  %v442_v9 = vadd.f32 %v441_v19, %v440_v62  ;;  %v528_v18 = vld [vmem:[#allocation7 + $0x8] sm:$0xff] }
  0x84   : > { %v448_v34 = vadd.f32 %v447_v29, %v446_v63  ;;  %v454_v10 = vadd.f32 %v453_v17, %v452_v0  ;;  %v530_v15 = vsel %vm529_vm0, %v412_v30, %v418_v20  ;;  %vm541_vm6 = vcmask 1046528  }
  0x85   : > { %v532_v16 = vsel %vm531_vm1, %v530_v15, %v424_v8  ;;  %v455_v5 = vrot.slane %v1865_v37, 4  ;;  %v461_v6 = vrot.slane %v1866_v38, 4  ;;  %v467_v41 = vrot.slane %v1857_v25, 4 }
  0x86   : > { %v534_v42 = vsel %vm533_vm2, %v532_v16, %v430_v7  ;;  %v473_v43 = vrot.slane %v1858_v26, 4  ;;  %v479_v44 = vrot.slane %v1859_v27, 4  ;;  %v485_v45 = vrot.slane %v1860_v28, 4 }
  0x87   : > { %v536_v46 = vsel %vm535_vm3, %v534_v42, %v436_v33  ;;  %v456_v47 = vadd.f32 %v455_v5, %v1865_v37  ;;  %v462_v48 = vadd.f32 %v461_v6, %v1866_v38  ;;  %v468_v49 = vadd.f32 %v467_v41, %v1857_v25 }
  0x88   : > { %v538_v51 = vsel %vm537_vm4, %v536_v46, %v442_v9  ;;  %v474_v52 = vadd.f32 %v473_v43, %v1858_v26  ;;  %v480_v1 = vadd.f32 %v479_v44, %v1859_v27  ;;  %v486_v2 = vadd.f32 %v485_v45, %v1860_v28 }
  0x89   : > { %v540_v3 = vsel %vm539_vm5, %v538_v51, %v448_v34  ;;  %v457_v4 = vrot.slane %v456_v47, 2  ;;  %v463_v11 = vrot.slane %v462_v48, 2  ;;  %v469_v12 = vrot.slane %v468_v49, 2 }
  0x8a   : > { %v542_v37 = vsel %vm541_vm6, %v540_v3, %v454_v10  ;;  %v475_v13 = vrot.slane %v474_v52, 2  ;;  %v481_v38 = vrot.slane %v480_v1, 2  ;;  %v487_v14 = vrot.slane %v486_v2, 2 }
  0x8b   : > { %v545_v25 = vadd.f32 %v542_v37, %v527_v50  ;;  %v458_v53 = vadd.f32 %v457_v4, %v456_v47  ;;  %v464_v54 = vadd.f32 %v463_v11, %v462_v48  ;;  %v470_v55 = vadd.f32 %v469_v12, %v468_v49 }
  0x8c   : > { %v476_v56 = vadd.f32 %v475_v13, %v474_v52  ;;  %v482_v26 = vadd.f32 %v481_v38, %v480_v1  ;;  %v488_v57 = vadd.f32 %v487_v14, %v486_v2  ;;  %v491_v27 = vrot.slane %v1861_v31, 4  ;;  %v549_v13 = vld [vmem:[#allocation8] sm:$0xff] }
  0x8d   : > { %547 = vst [vmem:[#allocation7] sm:$0xff] %v545_v25  ;;  %v459_v28 = vrot.slane %v458_v53, 1  ;;  %v465_v58 = vrot.slane %v464_v54, 1  ;;  %v471_v59 = vrot.slane %v470_v55, 1  ;;  %v497_v60 = vrot.slane %v1862_v32, 4 }
  0x8e   : > { %v477_v61 = vrot.slane %v476_v56, 1  ;;  %v483_v62 = vrot.slane %v482_v26, 1  ;;  %v489_v63 = vrot.slane %v488_v57, 1  ;;  %v492_v0 = vadd.f32 %v491_v27, %v1861_v31 }
  0x8f   : > { %v460_v21 = vadd.f32 %v459_v28, %v458_v53  ;;  %v466_v22 = vadd.f32 %v465_v58, %v464_v54  ;;  %v472_v23 = vadd.f32 %v471_v59, %v470_v55  ;;  %v498_v24 = vadd.f32 %v497_v60, %v1862_v32 }
  0x90   : > { %v478_v19 = vadd.f32 %v477_v61, %v476_v56  ;;  %v484_v29 = vadd.f32 %v483_v62, %v482_v26  ;;  %v490_v17 = vadd.f32 %v489_v63, %v488_v57  ;;  %v493_v30 = vrot.slane %v492_v0, 2  ;;  %v550_v56 = vld [vmem:[#allocation8 + $0x8] sm:$0xff] }
  0x91   : > { %v543_v31 = vsel %vm529_vm0, %v460_v21, %v466_v22  ;;  %v499_v20 = vrot.slane %v498_v24, 2  ;;  %v503_v8 = vrot.slane %v1863_v35, 4  ;;  %v509_v32 = vrot.slane %v1864_v36, 4 }
  0x92   : > { %v544_v7 = vsel %vm531_vm1, %v543_v31, 0.0  ;;  %v494_v33 = vadd.f32 %v493_v30, %v492_v0  ;;  %v551_v9 = vsel %vm529_vm0, %v472_v23, %v478_v19  ;;  %v515_v34 = vrot.slane %v1867_v39, 4 }
  0x93   : > { %v546_v10 = vadd.f32 %v544_v7, %v528_v18  ;;  %v500_v15 = vadd.f32 %v499_v20, %v498_v24  ;;  %v504_v16 = vadd.f32 %v503_v8, %v1863_v35  ;;  %v510_v5 = vadd.f32 %v509_v32, %v1864_v36 }
  0x94   : > { %v495_v6 = vrot.slane %v494_v33, 1  ;;  %v552_v41 = vsel %vm531_vm1, %v551_v9, %v484_v29  ;;  %v516_v42 = vadd.f32 %v515_v34, %v1867_v39  ;;  %v521_v43 = vrot.slane %v1868_v40, 4 }
  0x95   : > { %548 = vst [vmem:[#allocation7 + $0x8] sm:$0xff] %v546_v10  ;;  %v501_v44 = vrot.slane %v500_v15, 1  ;;  %v505_v45 = vrot.slane %v504_v16, 2  ;;  %v511_v46 = vrot.slane %v510_v5, 2  ;;  %v553_v47 = vsel %vm533_vm2, %v552_v41, %v490_v17 }
  0x96   : > { %v496_v48 = vadd.f32 %v495_v6, %v494_v33  ;;  %v517_v49 = vrot.slane %v516_v42, 2  ;;  %v522_v35 = vadd.f32 %v521_v43, %v1868_v40  ;;  %808 = dma.vmem_to_hbm [thread:$0]  (%p1785_p1), %s574_s8, 256, %s576_s11, [#allocation4], %s1410_s22, %s1410_s22, %s1411_s21  }
  0x97   : > { %v502_v36 = vadd.f32 %v501_v44, %v500_v15  ;;  %v506_v39 = vadd.f32 %v505_v45, %v504_v16  ;;  %v512_v50 = vadd.f32 %v511_v46, %v510_v5 }
  0x98   : > { %v554_v51 = vsel %vm535_vm3, %v553_v47, %v496_v48  ;;  %v518_v52 = vadd.f32 %v517_v49, %v516_v42  ;;  %v523_v1 = vrot.slane %v522_v35, 2 }
  0x99   : > { %v507_v2 = vrot.slane %v506_v39, 1  ;;  %v513_v3 = vrot.slane %v512_v50, 1  ;;  %v555_v4 = vsel %vm537_vm4, %v554_v51, %v502_v36 }
  0x9a   : > { %v519_v11 = vrot.slane %v518_v52, 1  ;;  %v524_v40 = vadd.f32 %v523_v1, %v522_v35 }
  0x9b   : > { %v508_v12 = vadd.f32 %v507_v2, %v506_v39  ;;  %v514_v37 = vadd.f32 %v513_v3, %v512_v50 }
  0x9c   : > { %v520_v38 = vadd.f32 %v519_v11, %v518_v52  ;;  %v525_v14 = vrot.slane %v524_v40, 1 }
  0x9d   : > { %v556_v25 = vsel %vm539_vm5, %v555_v4, %v508_v12 }
  0x9e   : > { %v557_v53 = vsel %vm541_vm6, %v556_v25, %v514_v37  ;;  %v526_v54 = vadd.f32 %v525_v14, %v524_v40 }
  0x9f   : > { %v560_v55 = vadd.f32 %v557_v53, %v549_v13 }
  0xa0   : > { %v558_v26 = vsel %vm529_vm0, %v520_v38, %v526_v54 }
  0xa1   : > { %562 = vst [vmem:[#allocation8] sm:$0xff] %v560_v55  ;;  %v559_v57 = vsel %vm531_vm1, %v558_v26, 0.0 }
  0xa2   : > { %v561_v27 = vadd.f32 %v559_v57, %v550_v56 }
  0xa4   : > { %563 = vst [vmem:[#allocation8 + $0x8] sm:$0xff] %v561_v27 }
  0xa5   : > { %810 = dma.vmem_to_hbm [thread:$0]  (%p1785_p1), %s592_s29, 256, %s594_s4, [#allocation9], %s1410_s22, %s1410_s22, %s1411_s21  }
  0xa6   : > { %1290 = dma.done.wait (%p1785_p1), [#allocation4], 256  }
  0xa7   : > { %1292 = vsyncadd (%p1785_p1), [#allocation4], 4294967040 }
  0xa8   : > { %1294 = dma.done.wait (%p1785_p1), [#allocation9], 256  }
  0xa9   : > { %1296 = vsyncadd (%p1785_p1), [#allocation9], 4294967040 }
  0xaa PF: > { %s22_s17 = sadd.s32 1, %s1319_s17   ;;  %s1892_s12 = smov %s1303_s13 }
  0xab   : > { %p19_p2 = scmp.ge.s32.totalorder %s22_s17, 6   ;;  %s1893_s13 = smov %s1307_s14 }
  0xac   : > { %s1894_s14 = smov %s1484_s24  ;;  %s1895_s15 = smov %s1315_s16 }
  0xad   : > { %s1896_s16 = smov %s1898_s19  ;;  %21 = sbr.rel (!%p19_p2) target bundleno = 8 (0x8), region = 112 }
  0xb2   :  { %615 = vsyncpa [#allocation3], 1 }
  0xb3   :  { %617 = vsyncpa [#allocation3 + $0x1], 1 }
  0xb4   :  { %618 = vsyncpa [#allocation6], 1 }
  0xb5   :  { %620 = vsyncpa [#allocation6 + $0x1], 1 }
  0xb6   :  { %621 = vsyncpa [#allocation4], 1 }
  0xb7   :  { %623 = vsyncpa [#allocation4 + $0x1], 1 }
  0xb8   :  { %624 = vsyncpa [#allocation9], 1 }

</bundles_post_ra>
